<compile_context>
chip_gen: v5e
topology: v5e:2x2
jax: 0.10.0
libtpu: 0.0.40
codegen_flags: <defaults>
</compile_context>

<pallas_src>
import functools

import jax
import jax.numpy as jnp
from jax.experimental import pallas as pl
from jax.experimental.pallas import tpu as pltpu

EPS = 1e-5


def _round_up(x, m):
    return ((x + m - 1) // m) * m


def _vmem_capacity_bytes():
    """Per-core VMEM capacity; conservative 64 MiB (v7x) fallback."""
    try:
        info = pltpu.get_tpu_info()
        for attr in ("vmem_capacity_bytes", "vmem_bytes", "vmem_size_bytes"):
            cap = getattr(info, attr, None)
            if cap:
                return int(cap)
    except Exception:
        pass
    return 64 << 20


# ---------------------------------------------------------------------------
# Fast path: whole batch resident in VMEM -> single fused kernel.
# ---------------------------------------------------------------------------
def _fused_kernel(x_ref, g1_ref, be1_ref, w1_ref, b1_ref,
                  g2_ref, be2_ref, w2_ref, b2_ref,
                  f_ref, out_ref, *, true_n):
    x = x_ref[...]                                        # (n_pad, d) f32
    n_pad = x.shape[0]
    inv_n = jnp.float32(1.0 / true_n)

    row = jax.lax.broadcasted_iota(jnp.int32, (n_pad, 1), 0)
    valid = (row < true_n).astype(jnp.float32)            # mask zero-padded rows

    # bn1 batch stats: exact two-pass variance (x is resident -> VPU only).
    mean1 = jnp.sum(x, axis=0, keepdims=True) * inv_n     # padded rows are zero
    xc = (x - mean1) * valid
    var1 = jnp.sum(xc * xc, axis=0, keepdims=True) * inv_n
    scale1 = g1_ref[...] * jax.lax.rsqrt(var1 + EPS)
    xn = (x - mean1) * scale1 + be1_ref[...]

    # fc1 on the MXU.
    f = jnp.dot(xn, w1_ref[...], preferred_element_type=jnp.float32) + b1_ref[...]
    f_ref[...] = f

    # bn2 batch stats over valid rows (two-pass, f resident).
    mean2 = jnp.sum(f * valid, axis=0, keepdims=True) * inv_n
    fcent = (f - mean2) * valid
    var2 = jnp.sum(fcent * fcent, axis=0, keepdims=True) * inv_n
    scale2 = g2_ref[...] * jax.lax.rsqrt(var2 + EPS)
    shift2 = be2_ref[...] - mean2 * scale2
    fb = f * scale2 + shift2

    # fc2: K=2 -> two rank-1 VPU updates (MXU would be wasted on K=2).
    w2 = w2_ref[...]
    out_ref[...] = fb[:, 0:1] * w2[0:1, :] + fb[:, 1:2] * w2[1:2, :] + b2_ref[...]


# ---------------------------------------------------------------------------
# Streaming path (large N): Pallas kernels for the two matmul-like steps.
# Batch-norm stats and the bn->linear folds are done in XLA (one HBM pass,
# megacore-sharded automatically on v7x).
# ---------------------------------------------------------------------------
def _fc1_kernel(x_ref, w1_ref, b1_ref, f_ref):
    # bn1 is already folded into (w1_eff, b1_eff): pure matmul + bias.
    f_ref[...] = (jnp.dot(x_ref[...], w1_ref[...],
                          preferred_element_type=jnp.float32) + b1_ref[...])


def _fc2_kernel(f_ref, w2_ref, b2_ref, out_ref):
    # bn2 is already folded into (w2_eff, b2_eff): rank-2 VPU update.
    f = f_ref[...]
    w2 = w2_ref[...]
    out_ref[...] = f[:, 0:1] * w2[0:1, :] + f[:, 1:2] * w2[1:2, :] + b2_ref[...]


# ---------------------------------------------------------------------------
# Wrapper
# ---------------------------------------------------------------------------
def _fused_path(x, params, w2, b2, n, d, c, c_out, vmem_limit):
    n_pad = _round_up(n, 8)
    if n_pad != n:
        x = jnp.pad(x, ((0, n_pad - n), (0, 0)))
    c2 = lambda i: (0, 0)

    f_pad, logits_pad = pl.pallas_call(
        functools.partial(_fused_kernel, true_n=n),
        grid=(1,),
        in_specs=[
            pl.BlockSpec((n_pad, d), c2),      # x
            pl.BlockSpec((1, d), c2),          # bn1 gamma
            pl.BlockSpec((1, d), c2),          # bn1 beta
            pl.BlockSpec((d, 2), c2),          # fc1 weight (in, out)
            pl.BlockSpec((1, 2), c2),          # fc1 bias
            pl.BlockSpec((1, 2), c2),          # bn2 gamma
            pl.BlockSpec((1, 2), c2),          # bn2 beta
            pl.BlockSpec((2, c_out), c2),      # fc2 weight (in, out), lane-padded
            pl.BlockSpec((1, c_out), c2),      # fc2 bias, lane-padded
        ],
        out_specs=(pl.BlockSpec((n_pad, 2), c2),
                   pl.BlockSpec((n_pad, c_out), c2)),
        out_shape=(jax.ShapeDtypeStruct((n_pad, 2), jnp.float32),
                   jax.ShapeDtypeStruct((n_pad, c_out), jnp.float32)),
        compiler_params=pltpu.CompilerParams(
            dimension_semantics=("arbitrary",),
            vmem_limit_bytes=int(vmem_limit)),
    )(x, params["bn1_gamma"], params["bn1_beta"], params["w1"], params["b1"],
      params["bn2_gamma"], params["bn2_beta"], w2, b2)

    return f_pad[:n], logits_pad[:n, :c]


def _streaming_path(x, params, w2, b2, n, d, c, c_out, cap, tile_n):
    # --- bn1 batch stats + fold into fc1 (XLA: single HBM pass over x) ---
    # NOTE: single-pass E[x^2] - mean^2 variance (clamped); can lose precision
    # for features with |mean| >> std.  Acceptable for typical activations.
    xsum = jnp.sum(x, axis=0)
    xsq = jnp.sum(x * x, axis=0)
    mean1 = xsum / n
    var1 = jnp.maximum(xsq / n - mean1 * mean1, 0.0)
    scale1 = params["bn1_gamma"][0] * jax.lax.rsqrt(var1 + EPS)      # (d,)
    shift1 = params["bn1_beta"][0] - mean1 * scale1                  # (d,)
    w1_eff = params["w1"] * scale1[:, None]                          # (d, 2)
    b1_eff = params["b1"] + shift1[None, :] @ params["w1"]           # (1, 2)

    d_pad = _round_up(d, 128)
    c_lane = max(_round_up(c_out, 128), 128)

    # Row tile: big enough to amortize per-step overhead, within VMEM budget.
    tile_budget = max(int(0.6 * (cap - (16 << 20))), 4 << 20)
    max_tile = tile_budget // (4 * 2 * (d_pad + 128))
    tile = max(8, min(_round_up(tile_n, 8), (max_tile // 8) * 8, _round_up(n, 8)))
    n_pad = _round_up(n, tile)
    xp = jnp.pad(x, ((0, n_pad - n), (0, 0))) if n_pad != n else x
    num_tiles = n_pad // tile

    vmem1 = 4 * (2 * tile * d_pad + 2 * tile * 128
                 + 2 * _round_up(d, 8) * 128 + 2 * 8 * 128) + (2 << 20)
    vmem1 = int(min(max(vmem1, 16 << 20), cap - (8 << 20)))

    f_pad = pl.pallas_call(
        _fc1_kernel,
        grid=(num_tiles,),
        in_specs=[pl.BlockSpec((tile, d), lambda i: (i, 0)),
                  pl.BlockSpec((d, 2), lambda i: (0, 0)),
                  pl.BlockSpec((1, 2), lambda i: (0, 0))],
        out_specs=pl.BlockSpec((tile, 2), lambda i: (i, 0)),
        out_shape=jax.ShapeDtypeStruct((n_pad, 2), jnp.float32),
        compiler_params=pltpu.CompilerParams(
            dimension_semantics=("parallel",),        # megacore-friendly
            vmem_limit_bytes=vmem1),
    )(xp, w1_eff, b1_eff)

    f = f_pad[:n]

    # --- bn2 batch stats + fold into fc2 (XLA; f is only N*2 floats) ---
    mean2 = jnp.mean(f, axis=0)
    var2 = jnp.mean(jnp.square(f - mean2), axis=0)
    scale2 = params["bn2_gamma"][0] * jax.lax.rsqrt(var2 + EPS)      # (2,)
    shift2 = params["bn2_beta"][0] - mean2 * scale2                  # (2,)
    w2_eff = w2 * scale2[:, None]                                    # (2, c_out)
    b2_eff = b2 + shift2[None, :] @ w2                               # (1, c_out)

    vmem2 = 4 * (2 * tile * 128 + 2 * tile * c_lane + 4 * 8 * c_lane) + (2 << 20)
    vmem2 = int(min(max(vmem2, 16 << 20), cap - (8 << 20)))

    logits_pad = pl.pallas_call(
        _fc2_kernel,
        grid=(num_tiles,),
        in_specs=[pl.BlockSpec((tile, 2), lambda i: (i, 0)),
                  pl.BlockSpec((2, c_out), lambda i: (0, 0)),
                  pl.BlockSpec((1, c_out), lambda i: (0, 0))],
        out_specs=pl.BlockSpec((tile, c_out), lambda i: (i, 0)),
        out_shape=jax.ShapeDtypeStruct((n_pad, c_out), jnp.float32),
        compiler_params=pltpu.CompilerParams(
            dimension_semantics=("parallel",),
            vmem_limit_bytes=vmem2),
    )(f_pad, w2_eff, b2_eff)

    return f, logits_pad[:n, :c]


def classblock_forward(x, params, *, tile_n=2048, force_streaming=False):
    """x: (N, input_dim) float32. Returns (f, logits) like the PyTorch module."""
    n, d = x.shape
    c = params["w2"].shape[1]

    # Lane-dense logits: pad class dim to a multiple of 128 when c >= 128
    # (full-lane stores); skip for small c where padding would inflate writes.
    c_out = _round_up(c, 128) if c >= 128 else c
    w2 = params["w2"]
    b2 = params["b2"]
    if c_out != c:
        w2 = jnp.pad(w2, ((0, 0), (0, c_out - c)))
        b2 = jnp.pad(b2, ((0, 0), (0, c_out - c)))

    cap = _vmem_capacity_bytes()
    d_pad = _round_up(d, 128)
    c_lane = max(_round_up(c_out, 128), 128)
    n8 = _round_up(n, 8)

    # Conservative footprint estimate of the fused single-block path
    # (inputs/outputs counted double-buffered).
    fused_bytes = 4 * (2 * n8 * d_pad + 2 * n8 * 128 + 2 * n8 * c_lane
                       + 4 * 8 * d_pad + 2 * _round_up(d, 8) * 128
                       + 4 * 8 * c_lane + 8 * 8 * 128)

    if (not force_streaming) and fused_bytes <= cap - (16 << 20):
        vmem_limit = min(max(fused_bytes + (8 << 20), 32 << 20), cap - (8 << 20))
        return _fused_path(x, params, w2, b2, n, d, c, c_out, vmem_limit)
    return _streaming_path(x, params, w2, b2, n, d, c, c_out, cap, tile_n)


def init_params(key, input_dim, class_num):
    """Deterministic init matching the PyTorch module's __init__."""
    k1, k2 = jax.random.split(key)
    # fc1: kaiming_normal_(a=0, mode='fan_out') on (out=2, in=input_dim):
    #      std = sqrt(2 / fan_out) = sqrt(2/2) = 1.0; bias = 0
    w1_pt = jax.random.normal(k1, (2, input_dim), jnp.float32)          # (2, D)
    # fc2: normal(std=0.001) on (class_num, 2); bias = 0
    w2_pt = jax.random.normal(k2, (class_num, 2), jnp.float32) * 0.001  # (C, 2)
    return {
        # BatchNorm default init: gamma = 1, beta = 0
        "bn1_gamma": jnp.ones((1, input_dim), jnp.float32),
        "bn1_beta": jnp.zeros((1, input_dim), jnp.float32),
        "bn2_gamma": jnp.ones((1, 2), jnp.float32),
        "bn2_beta": jnp.zeros((1, 2), jnp.float32),
        # kernel layouts: w1 as (in, out), w2 as (in, out)
        "w1": w1_pt.T,                               # (input_dim, 2)
        "b1": jnp.zeros((1, 2), jnp.float32),
        "w2": w2_pt.T,                               # (2, class_num)
        "b2": jnp.zeros((1, class_num), jnp.float32),
    }


def _reference_forward(x, params):
    """Pure-JAX reference for verification."""
    mean1 = jnp.mean(x, axis=0, keepdims=True)
    var1 = jnp.mean((x - mean1) ** 2, axis=0, keepdims=True)
    xbn = (x - mean1) / jnp.sqrt(var1 + EPS) * params["bn1_gamma"] + params["bn1_beta"]
    f = xbn @ params["w1"] + params["b1"]
    mean2 = jnp.mean(f, axis=0, keepdims=True)
    var2 = jnp.mean((f - mean2) ** 2, axis=0, keepdims=True)
    fbn = (f - mean2) / jnp.sqrt(var2 + EPS) * params["bn2_gamma"] + params["bn2_beta"]
    logits = fbn @ params["w2"] + params["b2"]
    return f, logits


def _check(f, logits, f_ref, logits_ref, n, c, tag):
    assert f.shape == (n, 2) and logits.shape == (n, c), tag
    assert jnp.allclose(f, f_ref, atol=2e-4, rtol=2e-4), \
        (tag, float(jnp.max(jnp.abs(f - f_ref))))
    assert jnp.allclose(logits, logits_ref, atol=2e-4, rtol=2e-4), \
        (tag, float(jnp.max(jnp.abs(logits - logits_ref))))


if __name__ == "__main__":
    key = jax.random.PRNGKey(0)
    kx, kp, kx2, kp2 = jax.random.split(key, 4)

    # Case 1: small batch, small class count -> fused single-kernel fast path.
    INPUT_DIM, CLASS_NUM, BATCH = 32, 8, 13      # non-aligned batch on purpose
    x = jax.random.normal(kx, (BATCH, INPUT_DIM), jnp.float32)
    params = init_params(kp, INPUT_DIM, CLASS_NUM)
    f, logits = classblock_forward(x, params)
    jax.block_until_ready((f, logits))
    f_ref, logits_ref = _reference_forward(x, params)
    _check(f, logits, f_ref, logits_ref, BATCH, CLASS_NUM, "fused")

    # Case 2: force the streaming (large-N) path on the same data with a tiny
    # row tile so the multi-tile "parallel" grid is exercised.
    f_s, logits_s = classblock_forward(x, params, tile_n=8, force_streaming=True)
    jax.block_until_ready((f_s, logits_s))
    _check(f_s, logits_s, f_ref, logits_ref, BATCH, CLASS_NUM, "streaming")

    # Case 3: class_num >= 128 and not a multiple of 128 -> exercises the
    # lane-padded logits output (padded to 256, sliced back to 200).
    INPUT_DIM3, CLASS_NUM3, BATCH3 = 32, 200, 16
    x3 = jax.random.normal(kx2, (BATCH3, INPUT_DIM3), jnp.float32)
    params3 = init_params(kp2, INPUT_DIM3, CLASS_NUM3)
    f3, logits3 = classblock_forward(x3, params3)
    jax.block_until_ready((f3, logits3))
    f3_ref, logits3_ref = _reference_forward(x3, params3)
    _check(f3, logits3, f3_ref, logits3_ref, BATCH3, CLASS_NUM3, "fused/lanepad")

    print("KERNEL_OK")
</pallas_src>

<mosaic_0001>
module attributes {stable_mosaic.version = 11 : i64} {
  func.func @_fused_kernel(%arg0: i32, %arg1: memref<16x32xf32, #tpu.memory_space<vmem>>, %arg2: memref<1x32xf32, #tpu.memory_space<vmem>>, %arg3: memref<1x32xf32, #tpu.memory_space<vmem>>, %arg4: memref<32x2xf32, #tpu.memory_space<vmem>>, %arg5: memref<1x2xf32, #tpu.memory_space<vmem>>, %arg6: memref<1x2xf32, #tpu.memory_space<vmem>>, %arg7: memref<1x2xf32, #tpu.memory_space<vmem>>, %arg8: memref<2x8xf32, #tpu.memory_space<vmem>>, %arg9: memref<1x8xf32, #tpu.memory_space<vmem>>, %arg10: memref<16x2xf32, #tpu.memory_space<vmem>>, %arg11: memref<16x8xf32, #tpu.memory_space<vmem>>) attributes {dimension_semantics = [#tpu.dimension_semantics<arbitrary>], iteration_bounds = array<i64: 1>, scalar_prefetch = 0 : i64, scratch_operands = 0 : i64, tpu.core_type = #tpu.core_type<tc>, window_params = [{pipeline_mode = #tpu.pipeline_mode<synchronous>, transform_indices = @transform_0, window_bounds = array<i64: 16, 32>}, {pipeline_mode = #tpu.pipeline_mode<synchronous>, transform_indices = @transform_1, window_bounds = array<i64: 1, 32>}, {pipeline_mode = #tpu.pipeline_mode<synchronous>, transform_indices = @transform_2, window_bounds = array<i64: 1, 32>}, {pipeline_mode = #tpu.pipeline_mode<synchronous>, transform_indices = @transform_3, window_bounds = array<i64: 32, 2>}, {pipeline_mode = #tpu.pipeline_mode<synchronous>, transform_indices = @transform_4, window_bounds = array<i64: 1, 2>}, {pipeline_mode = #tpu.pipeline_mode<synchronous>, transform_indices = @transform_5, window_bounds = array<i64: 1, 2>}, {pipeline_mode = #tpu.pipeline_mode<synchronous>, transform_indices = @transform_6, window_bounds = array<i64: 1, 2>}, {pipeline_mode = #tpu.pipeline_mode<synchronous>, transform_indices = @transform_7, window_bounds = array<i64: 2, 8>}, {pipeline_mode = #tpu.pipeline_mode<synchronous>, transform_indices = @transform_8, window_bounds = array<i64: 1, 8>}, {pipeline_mode = #tpu.pipeline_mode<synchronous>, transform_indices = @transform_9, window_bounds = array<i64: 16, 2>}, {pipeline_mode = #tpu.pipeline_mode<synchronous>, transform_indices = @transform_10, window_bounds = array<i64: 16, 8>}]} {
    %c0 = arith.constant 0 : index
    %c0_0 = arith.constant 0 : index
    %0 = vector.load %arg1[%c0, %c0_0] : memref<16x32xf32, #tpu.memory_space<vmem>>, vector<16x32xf32>
    %1 = tpu.iota {dimensions = array<i32: 0>} : vector<16x1xi32>
    %c13_i32 = arith.constant 13 : i32
    %2 = vector.broadcast %c13_i32 : i32 to vector<16x1xi32>
    %3 = arith.cmpi slt, %1, %2 : vector<16x1xi32>
    %4 = arith.extui %3 : vector<16x1xi1> to vector<16x1xi32>
    %5 = arith.sitofp %4 : vector<16x1xi32> to vector<16x1xf32>
    %cst = arith.constant dense<0.000000e+00> : vector<32xf32>
    %6 = vector.multi_reduction <add>, %0, %cst [0] : vector<16x32xf32> to vector<32xf32>
    %7 = vector.shape_cast %6 : vector<32xf32> to vector<1x32xf32>
    %cst_1 = arith.constant 0.0769230798 : f32
    %8 = vector.broadcast %cst_1 : f32 to vector<1x32xf32>
    %9 = arith.mulf %7, %8 : vector<1x32xf32>
    %10 = vector.broadcast %9 : vector<1x32xf32> to vector<16x32xf32>
    %11 = arith.subf %0, %10 : vector<16x32xf32>
    %12 = vector.broadcast %5 : vector<16x1xf32> to vector<16x32xf32>
    %13 = arith.mulf %11, %12 : vector<16x32xf32>
    %14 = arith.mulf %13, %13 : vector<16x32xf32>
    %cst_2 = arith.constant dense<0.000000e+00> : vector<32xf32>
    %15 = vector.multi_reduction <add>, %14, %cst_2 [0] : vector<16x32xf32> to vector<32xf32>
    %16 = vector.shape_cast %15 : vector<32xf32> to vector<1x32xf32>
    %cst_3 = arith.constant 0.0769230798 : f32
    %17 = vector.broadcast %cst_3 : f32 to vector<1x32xf32>
    %18 = arith.mulf %16, %17 : vector<1x32xf32>
    %c0_4 = arith.constant 0 : index
    %c0_5 = arith.constant 0 : index
    %19 = vector.load %arg2[%c0_4, %c0_5] : memref<1x32xf32, #tpu.memory_space<vmem>>, vector<1x32xf32>
    %cst_6 = arith.constant 9.99999974E-6 : f32
    %20 = vector.broadcast %cst_6 : f32 to vector<1x32xf32>
    %21 = arith.addf %18, %20 : vector<1x32xf32>
    %22 = math.rsqrt %21 : vector<1x32xf32>
    %23 = arith.mulf %19, %22 : vector<1x32xf32>
    %24 = vector.broadcast %9 : vector<1x32xf32> to vector<16x32xf32>
    %25 = arith.subf %0, %24 : vector<16x32xf32>
    %26 = vector.broadcast %23 : vector<1x32xf32> to vector<16x32xf32>
    %27 = arith.mulf %25, %26 : vector<16x32xf32>
    %c0_7 = arith.constant 0 : index
    %c0_8 = arith.constant 0 : index
    %28 = vector.load %arg3[%c0_7, %c0_8] : memref<1x32xf32, #tpu.memory_space<vmem>>, vector<1x32xf32>
    %29 = vector.broadcast %28 : vector<1x32xf32> to vector<16x32xf32>
    %30 = arith.addf %27, %29 : vector<16x32xf32>
    %c0_9 = arith.constant 0 : index
    %c0_10 = arith.constant 0 : index
    %31 = vector.load %arg4[%c0_9, %c0_10] : memref<32x2xf32, #tpu.memory_space<vmem>>, vector<32x2xf32>
    %cst_11 = arith.constant dense<0.000000e+00> : vector<16x2xf32>
    %32 = tpu.matmul %30, %31, %cst_11 {dimension_numbers = #tpu.dot_dimension_numbers<[1], [0], [0], [1], [0, 0, 1, 1], [], []>} : vector<16x32xf32>, vector<32x2xf32>, vector<16x2xf32> -> vector<16x2xf32>
    %c0_12 = arith.constant 0 : index
    %c0_13 = arith.constant 0 : index
    %33 = vector.load %arg5[%c0_12, %c0_13] : memref<1x2xf32, #tpu.memory_space<vmem>>, vector<1x2xf32>
    %34 = vector.broadcast %33 : vector<1x2xf32> to vector<16x2xf32>
    %35 = arith.addf %32, %34 : vector<16x2xf32>
    %c0_14 = arith.constant 0 : index
    %c0_15 = arith.constant 0 : index
    %36 = vector.load %arg10[%c0_14, %c0_15] : memref<16x2xf32, #tpu.memory_space<vmem>>, vector<16x2xf32>
    tpu.vector_store %arg10[%c0_14, %c0_15], %35 {strides = array<i32>} : memref<16x2xf32, #tpu.memory_space<vmem>>, vector<16x2xf32>,
    %37 = vector.broadcast %5 : vector<16x1xf32> to vector<16x2xf32>
    %38 = arith.mulf %35, %37 : vector<16x2xf32>
    %cst_16 = arith.constant dense<0.000000e+00> : vector<2xf32>
    %39 = vector.multi_reduction <add>, %38, %cst_16 [0] : vector<16x2xf32> to vector<2xf32>
    %40 = vector.shape_cast %39 : vector<2xf32> to vector<1x2xf32>
    %cst_17 = arith.constant 0.0769230798 : f32
    %41 = vector.broadcast %cst_17 : f32 to vector<1x2xf32>
    %42 = arith.mulf %40, %41 : vector<1x2xf32>
    %43 = vector.broadcast %42 : vector<1x2xf32> to vector<16x2xf32>
    %44 = arith.subf %35, %43 : vector<16x2xf32>
    %45 = vector.broadcast %5 : vector<16x1xf32> to vector<16x2xf32>
    %46 = arith.mulf %44, %45 : vector<16x2xf32>
    %47 = arith.mulf %46, %46 : vector<16x2xf32>
    %cst_18 = arith.constant dense<0.000000e+00> : vector<2xf32>
    %48 = vector.multi_reduction <add>, %47, %cst_18 [0] : vector<16x2xf32> to vector<2xf32>
    %49 = vector.shape_cast %48 : vector<2xf32> to vector<1x2xf32>
    %cst_19 = arith.constant 0.0769230798 : f32
    %50 = vector.broadcast %cst_19 : f32 to vector<1x2xf32>
    %51 = arith.mulf %49, %50 : vector<1x2xf32>
    %c0_20 = arith.constant 0 : index
    %c0_21 = arith.constant 0 : index
    %52 = vector.load %arg6[%c0_20, %c0_21] : memref<1x2xf32, #tpu.memory_space<vmem>>, vector<1x2xf32>
    %cst_22 = arith.constant 9.99999974E-6 : f32
    %53 = vector.broadcast %cst_22 : f32 to vector<1x2xf32>
    %54 = arith.addf %51, %53 : vector<1x2xf32>
    %55 = math.rsqrt %54 : vector<1x2xf32>
    %56 = arith.mulf %52, %55 : vector<1x2xf32>
    %c0_23 = arith.constant 0 : index
    %c0_24 = arith.constant 0 : index
    %57 = vector.load %arg7[%c0_23, %c0_24] : memref<1x2xf32, #tpu.memory_space<vmem>>, vector<1x2xf32>
    %58 = arith.mulf %42, %56 : vector<1x2xf32>
    %59 = arith.subf %57, %58 : vector<1x2xf32>
    %60 = vector.broadcast %56 : vector<1x2xf32> to vector<16x2xf32>
    %61 = arith.mulf %35, %60 : vector<16x2xf32>
    %62 = vector.broadcast %59 : vector<1x2xf32> to vector<16x2xf32>
    %63 = arith.addf %61, %62 : vector<16x2xf32>
    %c0_25 = arith.constant 0 : index
    %c0_26 = arith.constant 0 : index
    %64 = vector.load %arg8[%c0_25, %c0_26] : memref<2x8xf32, #tpu.memory_space<vmem>>, vector<2x8xf32>
    %65 = vector.extract_strided_slice %63 {offsets = [0, 0], sizes = [16, 1], strides = [1, 1]} : vector<16x2xf32> to vector<16x1xf32>
    %66 = vector.extract_strided_slice %64 {offsets = [0, 0], sizes = [1, 8], strides = [1, 1]} : vector<2x8xf32> to vector<1x8xf32>
    %67 = vector.broadcast %65 : vector<16x1xf32> to vector<16x8xf32>
    %68 = vector.broadcast %66 : vector<1x8xf32> to vector<16x8xf32>
    %69 = arith.mulf %67, %68 : vector<16x8xf32>
    %70 = vector.extract_strided_slice %63 {offsets = [0, 1], sizes = [16, 1], strides = [1, 1]} : vector<16x2xf32> to vector<16x1xf32>
    %71 = vector.extract_strided_slice %64 {offsets = [1, 0], sizes = [1, 8], strides = [1, 1]} : vector<2x8xf32> to vector<1x8xf32>
    %72 = vector.broadcast %70 : vector<16x1xf32> to vector<16x8xf32>
    %73 = vector.broadcast %71 : vector<1x8xf32> to vector<16x8xf32>
    %74 = arith.mulf %72, %73 : vector<16x8xf32>
    %75 = arith.addf %69, %74 : vector<16x8xf32>
    %c0_27 = arith.constant 0 : index
    %c0_28 = arith.constant 0 : index
    %76 = vector.load %arg9[%c0_27, %c0_28] : memref<1x8xf32, #tpu.memory_space<vmem>>, vector<1x8xf32>
    %77 = vector.broadcast %76 : vector<1x8xf32> to vector<16x8xf32>
    %78 = arith.addf %75, %77 : vector<16x8xf32>
    %c0_29 = arith.constant 0 : index
    %c0_30 = arith.constant 0 : index
    %79 = vector.load %arg11[%c0_29, %c0_30] : memref<16x8xf32, #tpu.memory_space<vmem>>, vector<16x8xf32>
    tpu.vector_store %arg11[%c0_29, %c0_30], %78 {strides = array<i32>} : memref<16x8xf32, #tpu.memory_space<vmem>>, vector<16x8xf32>,
    return
  }
  func.func @transform_0(%arg0: i32) -> (i32, i32) {
    %c0_i32 = arith.constant 0 : i32
    %c0_i32_0 = arith.constant 0 : i32
    %c0_i32_1 = arith.constant 0 : i32
    return %c0_i32, %c0_i32_0 : i32, i32
  }
  func.func @transform_1(%arg0: i32) -> (i32, i32) {
    %c0_i32 = arith.constant 0 : i32
    %c0_i32_0 = arith.constant 0 : i32
    %c0_i32_1 = arith.constant 0 : i32
    return %c0_i32, %c0_i32_0 : i32, i32
  }
  func.func @transform_2(%arg0: i32) -> (i32, i32) {
    %c0_i32 = arith.constant 0 : i32
    %c0_i32_0 = arith.constant 0 : i32
    %c0_i32_1 = arith.constant 0 : i32
    return %c0_i32, %c0_i32_0 : i32, i32
  }
  func.func @transform_3(%arg0: i32) -> (i32, i32) {
    %c0_i32 = arith.constant 0 : i32
    %c0_i32_0 = arith.constant 0 : i32
    %c0_i32_1 = arith.constant 0 : i32
    return %c0_i32, %c0_i32_0 : i32, i32
  }
  func.func @transform_4(%arg0: i32) -> (i32, i32) {
    %c0_i32 = arith.constant 0 : i32
    %c0_i32_0 = arith.constant 0 : i32
    %c0_i32_1 = arith.constant 0 : i32
    return %c0_i32, %c0_i32_0 : i32, i32
  }
  func.func @transform_5(%arg0: i32) -> (i32, i32) {
    %c0_i32 = arith.constant 0 : i32
    %c0_i32_0 = arith.constant 0 : i32
    %c0_i32_1 = arith.constant 0 : i32
    return %c0_i32, %c0_i32_0 : i32, i32
  }
  func.func @transform_6(%arg0: i32) -> (i32, i32) {
    %c0_i32 = arith.constant 0 : i32
    %c0_i32_0 = arith.constant 0 : i32
    %c0_i32_1 = arith.constant 0 : i32
    return %c0_i32, %c0_i32_0 : i32, i32
  }
  func.func @transform_7(%arg0: i32) -> (i32, i32) {
    %c0_i32 = arith.constant 0 : i32
    %c0_i32_0 = arith.constant 0 : i32
    %c0_i32_1 = arith.constant 0 : i32
    return %c0_i32, %c0_i32_0 : i32, i32
  }
  func.func @transform_8(%arg0: i32) -> (i32, i32) {
    %c0_i32 = arith.constant 0 : i32
    %c0_i32_0 = arith.constant 0 : i32
    %c0_i32_1 = arith.constant 0 : i32
    return %c0_i32, %c0_i32_0 : i32, i32
  }
  func.func @transform_9(%arg0: i32) -> (i32, i32) {
    %c0_i32 = arith.constant 0 : i32
    %c0_i32_0 = arith.constant 0 : i32
    %c0_i32_1 = arith.constant 0 : i32
    return %c0_i32, %c0_i32_0 : i32, i32
  }
  func.func @transform_10(%arg0: i32) -> (i32, i32) {
    %c0_i32 = arith.constant 0 : i32
    %c0_i32_0 = arith.constant 0 : i32
    %c0_i32_1 = arith.constant 0 : i32
    return %c0_i32, %c0_i32_0 : i32, i32
  }
}

</mosaic_0001>

<bundles_post_ra>
// kernel: tpu_custom_call.1
= control target key start
LH: loop header
LB: loop body
LE: loop exit
PB: predicated region body
PF: predicated region fallthrough
CT: control target
= control target key end

     0   :  { %vm45_vm0 = vcmask 261120   ;;  %v36_v7 = vlaneseq  ;;  %v254_v19 = vmov 0.0   ;;  %vm133_vm5 = vcmask 15360   ;;  %s380_s3 = inlined_call_operand.vmem [shape: f32[32,2], index: 3, kind: input, shape index: {}]   ;;  %s381_s0 = inlined_call_operand.vmem [shape: f32[16,32], index: 0, kind: input, shape index: {}]   ;;  %s382_s2 = inlined_call_operand.vmem [shape: f32[1,32], index: 2, kind: input, shape index: {}]   ;;  %s383_s4 = inlined_call_operand.vmem [shape: f32[1,2], index: 4, kind: input, shape index: {}]   ;;  %s384_s1 = inlined_call_operand.vmem [shape: f32[1,32], index: 1, kind: input, shape index: {}]   ;;  %s385_s9 = inlined_call_operand.vmem [shape: f32[16,2], index: 9, kind: output, shape index: {0}]   ;;  %s386_s5 = inlined_call_operand.vmem [shape: f32[1,2], index: 5, kind: input, shape index: {}]   ;;  %s387_s8 = inlined_call_operand.vmem [shape: f32[1,8], index: 8, kind: input, shape index: {}]   ;;  %s388_s6 = inlined_call_operand.vmem [shape: f32[1,2], index: 6, kind: input, shape index: {}]   ;;  %s389_s7 = inlined_call_operand.vmem [shape: f32[2,8], index: 7, kind: input, shape index: {}]   ;;  %s390_s10 = inlined_call_operand.vmem [shape: f32[16,8], index: 10, kind: output, shape index: {1}]  }
   0x1   :  { %v99_v0 = vld [vmem:[%s380_s3 + $0x18] sm:$0xff]  ;;  %v98_v1 = vld [vmem:[%s380_s3 + $0x10] sm:$0xff]  ;;  %v97_v2 = vld [vmem:[%s380_s3 + $0x8] sm:$0xff]  ;;  %v255_v62 = vmov 1   ;;  %v256_v63 = vmov 0   ;;  %vm223_vm9 = vcmask 64512  }
   0x2   :  { %237 = vmatpush.msra.mxu1 %v99_v0  ;;  %122 = vmatpush.msra.mxu0 %v99_v0  ;;  %v34_v3 = vld [vmem:[%s381_s0] sm:$0xff]  ;;  %v35_v4 = vld [vmem:[%s381_s0 + $0x8] sm:$0xff]  ;;  %v37_v11 = vshrl.u32 %v36_v7, 7 }
   0x3   :  { %v46_v5 = vsel %vm45_vm0, %v34_v3, 0.0  ;;  %v47_v6 = vsel %vm45_vm0, %v35_v4, 0.0  ;;  %v96_v9 = vld [vmem:[%s380_s3] sm:$0xff]  ;;  %245 = vset.pattern.permute.xlu1 %v255_v62  ;;  %244 = vset.pattern.permute.xlu0 %v256_v63 }
   0x4   :  { %238 = vmatpush.msra.mxu1 %v98_v1  ;;  %123 = vmatpush.msra.mxu0 %v98_v1  ;;  %v48_v8 = vadd.f32 %v47_v6, %v46_v5  ;;  %v38_v14 = vadd.s32 8, %v37_v11  ;;  %v72_v42 = vld [vmem:[%s384_s1] sm:$0x1] }
   0x5   :  { %v247_v47 = vld [vmem:[%s382_s2] ss:$0 sm:$0xff] }
   0x6   :  { %239 = vmatpush.msra.mxu1 %v97_v2  ;;  %124 = vmatpush.msra.mxu0 %v97_v2  ;;  %v49_v10 = vrot.slane %v48_v8, 4  ;;  %vm40_vm1 = vcmp.lt.s32.totalorder %v38_v14, 13  ;;  %v248_v52 = vld [vmem:[%s383_s4] ss:$0 sm:$0xff] }
   0x7   :  { %v332_v20 = vsel %vm40_vm1, 1.0, %v254_v19 }
   0x8   :  { %240 = vmatpush.msra.mxu1 %v96_v9  ;;  %v50_v12 = vadd.f32 %v49_v10, %v48_v8  ;;  %125 = vmatpush.msra.mxu0 %v96_v9 }
   0xa   :  { %v51_v13 = vrot.slane %v50_v12, 2 }
   0xc   :  { %v52_v15 = vadd.f32 %v51_v13, %v50_v12 }
   0xe   :  { %v53_v16 = vrot.slane %v52_v15, 1 }
  0x10   :  { %v54_v17 = vadd.f32 %v53_v16, %v52_v15 }
  0x12   :  { %v55_v18 = vmul.f32 0.07692308, %v54_v17 }
  0x14   :  { %v56_v21 = vsub.f32 %v34_v3, %v55_v18  ;;  %v57_v22 = vsub.f32 %v35_v4, %v55_v18 }
  0x16   :  { %v59_v23 = vmul.f32 %v332_v20, %v57_v22  ;;  %v60_v24 = vmul.f32 %v56_v21, %v56_v21 }
  0x18   :  { %v61_v25 = vmul.f32 %v59_v23, %v59_v23  ;;  %v62_v26 = vsel %vm45_vm0, %v60_v24, 0.0 }
  0x1a   :  { %v63_v27 = vsel %vm45_vm0, %v61_v25, 0.0 }
  0x1b   :  { %v64_v28 = vadd.f32 %v63_v27, %v62_v26  ;;  %v164_v27 = vld [vmem:[%s386_s5] sm:$0x1] }
  0x1d   :  { %v65_v29 = vrot.slane %v64_v28, 4 }
  0x1f   :  { %v66_v30 = vadd.f32 %v65_v29, %v64_v28 }
  0x21   :  { %v67_v31 = vrot.slane %v66_v30, 2 }
  0x23   :  { %v68_v32 = vadd.f32 %v67_v31, %v66_v30  ;;  %v177_v31 = vld [vmem:[%s388_s6] sm:$0x1] }
  0x25   :  { %v69_v33 = vrot.slane %v68_v32, 1 }
  0x27   :  { %v70_v34 = vadd.f32 %v69_v33, %v68_v32 }
  0x29   :  { %v71_v35 = vmul.f32 0.07692308, %v70_v34 }
  0x2b   :  { %v73_v36 = vadd.f32 1e-05, %v71_v35 }
  0x2d   :  { %250 = vrsqrt.f32 %v73_v36  ;;  %vm80_vm2 = vweird.f32 %v73_v36 }
  0x33   :  { %v251_v37 = vpop.eup %250 }
  0x34   :  { %v75_v38 = vmul.f32 %v251_v37, %v73_v36  ;;  %vm81_vm3 = vweird.f32 %v251_v37 }
  0x35   :  { %vm82_vm4 = vmor %vm80_vm2, %vm81_vm3 }
  0x36   :  { %v76_v39 = vmul.f32 %v251_v37, %v75_v38 }
  0x38   :  { %v77_v40 = vmul.f32 0.5, %v76_v39 }
  0x3a   :  { %v78_v41 = vsub.f32 1.5, %v77_v40  ;;  %v190_v40 = vld [vmem:[%s389_s7] sm:$0x3] }
  0x3c   :  { %v79_v43 = vmul.f32 %v251_v37, %v78_v41  ;;  %v212_v41 = vperm.slane %v190_v40, 1 }
  0x3e   :  { %v83_v44 = vsel %vm82_vm4, %v251_v37, %v79_v43 }
  0x3f   :  { %v84_v45 = vmul.f32 %v83_v44, %v72_v42  ;;  %v201_v42 = vperm.slane %v190_v40, 0 }
  0x41   :  { %v86_v46 = vperm.slane %v84_v45, 0 }
  0x43   :  { %v89_v48 = vmul.f32 %v86_v46, %v57_v22  ;;  %v88_v49 = vmul.f32 %v86_v46, %v56_v21  ;;  %v249_v46 = vld [vmem:[%s387_s8] ss:$0 sm:$0xff] }
  0x45   :  { %v95_v50 = vadd.f32 %v247_v47, %v89_v48  ;;  %v94_v51 = vadd.f32 %v247_v47, %v88_v49 }
  0x47   :  { %236 = vmatmul.msk.f32.vlgmr.msra.gmra.mxu1 %vm45_vm0, %v95_v50  ;;  %235 = vmatmul.msk.f32.vlgmr.msra.gmra.mxu0 %vm45_vm0, %v94_v51 }
  0xc4   :  { %v130_v53 = vpop.f32.mrf.mxu1  ;;  %v127_v54 = vpop.f32.mrf.mxu0 }
  0xc5   :  { %v131_v55 = vadd.f32 %v248_v52, %v130_v53  ;;  %v128_v56 = vadd.f32 %v248_v52, %v127_v54 }
  0xc7   :  { %135 = vst.msk [vmem:[%s385_s9 + $0x8] sm:$0xff] %vm133_vm5, %v131_v55  ;;  %v137_v57 = vmul.f32 %v332_v20, %v131_v55  ;;  %v138_v58 = vsel %vm133_vm5, %v128_v56, 0.0 }
  0xc8   :  { %134 = vst.msk [vmem:[%s385_s9] sm:$0xff] %vm133_vm5, %v128_v56 }
  0xc9   :  { %v139_v59 = vsel %vm133_vm5, %v137_v57, 0.0 }
  0xca   :  { %v140_v60 = vadd.f32 %v139_v59, %v138_v58 }
  0xcc   :  { %v141_v61 = vrot.slane %v140_v60, 4 }
  0xce   :  { %v142_v0 = vadd.f32 %v141_v61, %v140_v60 }
  0xd0   :  { %v143_v1 = vrot.slane %v142_v0, 2 }
  0xd2   :  { %v144_v2 = vadd.f32 %v143_v1, %v142_v0 }
  0xd4   :  { %v145_v3 = vrot.slane %v144_v2, 1 }
  0xd6   :  { %v146_v4 = vadd.f32 %v145_v3, %v144_v2 }
  0xd8   :  { %v147_v5 = vmul.f32 0.07692308, %v146_v4 }
  0xda   :  { %v148_v6 = vsub.f32 %v128_v56, %v147_v5  ;;  %v149_v7 = vsub.f32 %v131_v55, %v147_v5 }
  0xdc   :  { %v151_v8 = vmul.f32 %v332_v20, %v149_v7  ;;  %v152_v9 = vmul.f32 %v148_v6, %v148_v6 }
  0xde   :  { %v153_v10 = vmul.f32 %v151_v8, %v151_v8  ;;  %v154_v11 = vsel %vm133_vm5, %v152_v9, 0.0 }
  0xe0   :  { %v155_v12 = vsel %vm133_vm5, %v153_v10, 0.0 }
  0xe1   :  { %v156_v13 = vadd.f32 %v155_v12, %v154_v11 }
  0xe3   :  { %v157_v14 = vrot.slane %v156_v13, 4 }
  0xe5   :  { %v158_v15 = vadd.f32 %v157_v14, %v156_v13 }
  0xe7   :  { %v159_v16 = vrot.slane %v158_v15, 2 }
  0xe9   :  { %v160_v17 = vadd.f32 %v159_v16, %v158_v15 }
  0xeb   :  { %v161_v18 = vrot.slane %v160_v17, 1 }
  0xed   :  { %v162_v19 = vadd.f32 %v161_v18, %v160_v17 }
  0xef   :  { %v163_v21 = vmul.f32 0.07692308, %v162_v19 }
  0xf1   :  { %v165_v22 = vadd.f32 1e-05, %v163_v21 }
  0xf3   :  { %252 = vrsqrt.f32 %v165_v22  ;;  %vm172_vm7 = vweird.f32 %v165_v22 }
  0xf9   :  { %v253_v23 = vpop.eup %252 }
  0xfa   :  { %v167_v24 = vmul.f32 %v253_v23, %v165_v22  ;;  %vm173_vm6 = vweird.f32 %v253_v23 }
  0xfb   :  { %vm174_vm8 = vmor %vm172_vm7, %vm173_vm6 }
  0xfc   :  { %v168_v25 = vmul.f32 %v253_v23, %v167_v24 }
  0xfe   :  { %v169_v20 = vmul.f32 0.5, %v168_v25 }
 0x100   :  { %v170_v26 = vsub.f32 1.5, %v169_v20 }
 0x102   :  { %v171_v28 = vmul.f32 %v253_v23, %v170_v26 }
 0x104   :  { %v175_v29 = vsel %vm174_vm8, %v253_v23, %v171_v28 }
 0x105   :  { %v176_v30 = vmul.f32 %v175_v29, %v164_v27 }
 0x107   :  { %v178_v32 = vmul.f32 %v176_v30, %v147_v5  ;;  %v181_v33 = vperm.slane %v176_v30, 0 }
 0x109   :  { %v179_v34 = vsub.f32 %v177_v31, %v178_v32  ;;  %v183_v35 = vmul.f32 %v181_v33, %v128_v56  ;;  %v184_v38 = vmul.f32 %v181_v33, %v131_v55 }
 0x10b   :  { %v186_v36 = vperm.slane %v179_v34, 0 }
 0x10d   :  { %v188_v37 = vadd.f32 %v186_v36, %v183_v35  ;;  %v189_v39 = vadd.f32 %v186_v36, %v184_v38 }
 0x10f   :  { %205 = vperm.xlu1 %245, %v188_v37   ;;  %193 = vperm.xlu0 %244, %v188_v37  }
 0x117   :  { %209 = vperm.xlu1 %245, %v189_v39   ;;  %198 = vperm.xlu0 %244, %v189_v39  }
 0x11f   :  { %246 = vset.pattern.permute.xlu0 %v255_v62 }
 0x181   :  { %v206_v43 = vpop.permute.xlu1 %205  ;;  %v194_v44 = vpop.permute.xlu0 %193 }
 0x182   :  { %v213_v45 = vmul.f32 %v212_v41, %v206_v43  ;;  %v202_v47 = vmul.f32 %v201_v42, %v194_v44 }
 0x184   :  { %v215_v48 = vadd.f32 %v213_v45, %v202_v47 }
 0x186   :  { %v221_v49 = vadd.f32 %v249_v46, %v215_v48 }
 0x188   :  { %224 = vst.msk [vmem:[%s390_s10] sm:$0xff] %vm223_vm9, %v221_v49 }
 0x189   :  { %v210_v50 = vpop.permute.xlu1 %209  ;;  %v199_v51 = vpop.permute.xlu0 %198 }
 0x18a   :  { %v214_v52 = vmul.f32 %v212_v41, %v210_v50  ;;  %v203_v53 = vmul.f32 %v201_v42, %v199_v51 }
 0x18c   :  { %v216_v54 = vadd.f32 %v214_v52, %v203_v53 }
 0x18e   :  { %v222_v55 = vadd.f32 %v249_v46, %v216_v54 }
 0x190   :  { %225 = vst.msk [vmem:[%s390_s10 + $0x8] sm:$0xff] %vm223_vm9, %v222_v55 }

</bundles_post_ra>
